<compile_context>
chip_gen: v6e
topology: v6e:2x2x1
jax: 0.10.0
libtpu: 0.0.40
codegen_flags: <defaults>
</compile_context>

<pallas_src>
import jax
import jax.numpy as jnp
from jax.experimental import pallas as pl
from jax.experimental.pallas import tpu as pltpu

_LANE = 128
_SUB = 8
_PARTIAL_ROWS_MAX = 64          # 8 independent f32 accumulator vregs / product
_MAX_BLOCK_BYTES = 2 << 20      # ~2 MiB per input stream per grid step


def _make_proj_partial_kernel(block_rows, partial_rows, total_rows, has_tail):
    """Per grid step: (partial_rows, 128) partials of sum(y*x) and sum(x*x)."""
    groups = block_rows // partial_rows

    def fold(a):
        # Split the leading dim only (layout-free reshape); axis-0 reduce is
        # pure VALU vreg adds onto `partial_rows // 8` independent accumulator
        # vregs -> shallow dependency chains, no cross-lane work in-kernel.
        return a.reshape(groups, partial_rows, _LANE).sum(axis=0)

    def kernel(old_ref, new_ref, orig_ref, yx_ref, xx_ref):
        # Upcast in-kernel (VPU has slack); HBM traffic stays in native dtype.
        orig = orig_ref[...].astype(jnp.float32)
        x = old_ref[...].astype(jnp.float32) - orig
        y = new_ref[...].astype(jnp.float32) - orig

        if has_tail:
            i = pl.program_id(0)
            last = pl.num_programs(0) - 1

            @pl.when(i != last)
            def _():
                yx_ref[...] = fold(y * x)
                xx_ref[...] = fold(x * x)

            @pl.when(i == last)
            def _():
                # Only the final block can read past the array end
                # (unspecified values); mask BOTH operands so garbage/NaN
                # cannot leak into either product.
                row_ids = jax.lax.broadcasted_iota(
                    jnp.int32, (block_rows, _LANE), 0)
                mask = (row_ids + i * block_rows) < total_rows
                xm = jnp.where(mask, x, 0.0)
                ym = jnp.where(mask, y, 0.0)
                yx_ref[...] = fold(ym * xm)
                xx_ref[...] = fold(xm * xm)
        else:
            yx_ref[...] = fold(y * x)
            xx_ref[...] = fold(x * x)

    return kernel


def proj_loss(old_attack_mid, new_mid, original_mid, coeff=None):
    """Returns a (1, 1) float32 array, matching Proj_Loss.forward."""
    del coeff  # unused by the reference forward pass

    # Unify dtype (no-op when the three activations already match, the
    # expected case) so block sizing / sublane alignment is consistent.
    dtype = jnp.result_type(old_attack_mid, new_mid, original_mid)
    itemsize = jnp.dtype(dtype).itemsize

    n = old_attack_mid.size

    # Per-dtype sublane tiling: 8 rows f32, 16 rows bf16, 32 rows int8/fp8.
    sub_align = max(_SUB, 32 // itemsize)
    min_tile = sub_align * _LANE

    # Fallback zero-pad only if the flat size is not a multiple of the dtype
    # tile; zeros contribute 0 to both dot products. Typical activation sizes
    # hit the no-pad path where reshape is metadata-only (no extra HBM copy).
    pad = (-n) % min_tile
    rows = (n + pad) // _LANE            # always a multiple of sub_align

    def prep(a):
        a = a.reshape(-1).astype(dtype)  # astype is a no-op if already `dtype`
        if pad:
            a = jnp.pad(a, (0, pad))
        return a.reshape(rows, _LANE)

    old2d = prep(old_attack_mid)
    new2d = prep(new_mid)
    orig2d = prep(original_mid)

    # --- Block sizing -------------------------------------------------------
    # ~2 MiB per input per step amortizes the ~0.35 us/step pipeline overhead
    # even at v7x's 3.2 TB/s, but cap so there are >= 4 grid steps (pipeline
    # overlap + megacore sharding) whenever the input is large enough.
    max_block_rows = max(sub_align, _MAX_BLOCK_BYTES // (_LANE * itemsize))
    target_rows = min(max_block_rows, max(sub_align, pl.cdiv(rows, 4)))
    # Keep block_rows a multiple of 64 (whole partial-fold groups) when
    # possible, otherwise of the dtype sublane alignment.
    align = _PARTIAL_ROWS_MAX if target_rows >= _PARTIAL_ROWS_MAX else sub_align
    block_rows = max(align, (target_rows // align) * align)
    block_rows = min(block_rows, rows)

    num_blocks = pl.cdiv(rows, block_rows)
    has_tail = (rows % block_rows) != 0
    partial_rows = min(_PARTIAL_ROWS_MAX, block_rows)   # divides block_rows

    in_spec = pl.BlockSpec((block_rows, _LANE), lambda i: (i, 0))
    out_spec = pl.BlockSpec((partial_rows, _LANE), lambda i: (i, 0))
    partial_shape = jax.ShapeDtypeStruct(
        (num_blocks * partial_rows, _LANE), jnp.float32)

    # --- VMEM budget, scaled with the block size ----------------------------
    #   inputs: 3 streams x 2 pipeline buffers x native-dtype block
    #   outputs: 2 partials x 2 buffers x f32 partial block (tiny)
    #   in-kernel f32 temporaries (orig upcast, x, y, products): ~5 blocks,
    #   budget 6 for slack, plus fixed headroom for Mosaic-internal scratch.
    in_block_bytes = block_rows * _LANE * itemsize
    f32_block_bytes = block_rows * _LANE * 4
    out_block_bytes = partial_rows * _LANE * 4
    vmem_limit = int(3 * 2 * in_block_bytes
                     + 2 * 2 * out_block_bytes
                     + 6 * f32_block_bytes
                     + (4 << 20))

    kernel = _make_proj_partial_kernel(block_rows, partial_rows, rows, has_tail)

    p_yx, p_xx = pl.pallas_call(
        kernel,
        out_shape=(partial_shape, partial_shape),
        grid_spec=pltpu.PrefetchScalarGridSpec(
            num_scalar_prefetch=0,
            grid=(num_blocks,),
            in_specs=[in_spec, in_spec, in_spec],
            out_specs=(out_spec, out_spec),
        ),
        compiler_params=pltpu.CompilerParams(
            dimension_semantics=("parallel",),
            vmem_limit_bytes=vmem_limit,
        ),
    )(old2d, new2d, orig2d)

    # Tiny epilogue (XLA): reduce the per-block partials and finish the math.
    s_yx = jnp.sum(p_yx)
    s_xx = jnp.sum(p_xx)
    norm = jnp.sqrt(s_xx)
    # Mirror torch: (y @ (x / ||x||).T) / ||x||
    return ((s_yx / norm) / norm).reshape(1, 1)


if __name__ == "__main__":
    # Small NCHW feature maps (mid-layer activations), batch=2, C=4, H=W=16.
    key = jax.random.PRNGKey(0)
    k1, k2, k3 = jax.random.split(key, 3)
    shape = (2, 4, 16, 16)
    old_attack_mid = jax.random.normal(k1, shape, dtype=jnp.float32)
    new_mid = jax.random.normal(k2, shape, dtype=jnp.float32)
    original_mid = jax.random.normal(k3, shape, dtype=jnp.float32)
    coeff = 1.0

    out = proj_loss(old_attack_mid, new_mid, original_mid, coeff)
    out = jax.block_until_ready(out)

    # Pure-JAX reference check.
    x = (old_attack_mid - original_mid).reshape(1, -1)
    y = (new_mid - original_mid).reshape(1, -1)
    xn = jnp.linalg.norm(x)
    ref = (y @ (x / xn).T) / xn
    assert out.shape == (1, 1)
    assert jnp.allclose(out, ref, rtol=1e-5, atol=1e-6)

    print("KERNEL_OK")
</pallas_src>

<mosaic_0001>
module attributes {stable_mosaic.version = 11 : i64} {
  func.func @kernel(%arg0: i32, %arg1: memref<8x128xf32, #tpu.memory_space<vmem>>, %arg2: memref<8x128xf32, #tpu.memory_space<vmem>>, %arg3: memref<8x128xf32, #tpu.memory_space<vmem>>, %arg4: memref<8x128xf32, #tpu.memory_space<vmem>>, %arg5: memref<8x128xf32, #tpu.memory_space<vmem>>) attributes {dimension_semantics = [#tpu.dimension_semantics<parallel>], iteration_bounds = array<i64: 2>, scalar_prefetch = 0 : i64, scratch_operands = 0 : i64, tpu.core_type = #tpu.core_type<tc>, window_params = [{transform_indices = @transform_0, window_bounds = array<i64: 8, 128>}, {transform_indices = @transform_1, window_bounds = array<i64: 8, 128>}, {transform_indices = @transform_2, window_bounds = array<i64: 8, 128>}, {transform_indices = @transform_3, window_bounds = array<i64: 8, 128>}, {transform_indices = @transform_4, window_bounds = array<i64: 8, 128>}]} {
    %c0 = arith.constant 0 : index
    %c0_0 = arith.constant 0 : index
    %0 = vector.load %arg3[%c0, %c0_0] : memref<8x128xf32, #tpu.memory_space<vmem>>, vector<8x128xf32>
    %c0_1 = arith.constant 0 : index
    %c0_2 = arith.constant 0 : index
    %1 = vector.load %arg1[%c0_1, %c0_2] : memref<8x128xf32, #tpu.memory_space<vmem>>, vector<8x128xf32>
    %2 = arith.subf %1, %0 : vector<8x128xf32>
    %c0_3 = arith.constant 0 : index
    %c0_4 = arith.constant 0 : index
    %3 = vector.load %arg2[%c0_3, %c0_4] : memref<8x128xf32, #tpu.memory_space<vmem>>, vector<8x128xf32>
    %4 = arith.subf %3, %0 : vector<8x128xf32>
    %5 = arith.mulf %4, %2 : vector<8x128xf32>
    %6 = vector.shape_cast %5 : vector<8x128xf32> to vector<1x8x128xf32>
    %cst = arith.constant dense<0.000000e+00> : vector<8x128xf32>
    %7 = vector.multi_reduction <add>, %6, %cst [0] : vector<1x8x128xf32> to vector<8x128xf32>
    %c0_5 = arith.constant 0 : index
    %c0_6 = arith.constant 0 : index
    %8 = vector.load %arg4[%c0_5, %c0_6] : memref<8x128xf32, #tpu.memory_space<vmem>>, vector<8x128xf32>
    tpu.vector_store %arg4[%c0_5, %c0_6], %7 {strides = array<i32>} : memref<8x128xf32, #tpu.memory_space<vmem>>, vector<8x128xf32>,
    %9 = arith.mulf %2, %2 : vector<8x128xf32>
    %10 = vector.shape_cast %9 : vector<8x128xf32> to vector<1x8x128xf32>
    %cst_7 = arith.constant dense<0.000000e+00> : vector<8x128xf32>
    %11 = vector.multi_reduction <add>, %10, %cst_7 [0] : vector<1x8x128xf32> to vector<8x128xf32>
    %c0_8 = arith.constant 0 : index
    %c0_9 = arith.constant 0 : index
    %12 = vector.load %arg5[%c0_8, %c0_9] : memref<8x128xf32, #tpu.memory_space<vmem>>, vector<8x128xf32>
    tpu.vector_store %arg5[%c0_8, %c0_9], %11 {strides = array<i32>} : memref<8x128xf32, #tpu.memory_space<vmem>>, vector<8x128xf32>,
    return
  }
  func.func @transform_0(%arg0: i32) -> (i32, i32) {
    %c0_i32 = arith.constant 0 : i32
    %c0_i32_0 = arith.constant 0 : i32
    return %arg0, %c0_i32 : i32, i32
  }
  func.func @transform_1(%arg0: i32) -> (i32, i32) {
    %c0_i32 = arith.constant 0 : i32
    %c0_i32_0 = arith.constant 0 : i32
    return %arg0, %c0_i32 : i32, i32
  }
  func.func @transform_2(%arg0: i32) -> (i32, i32) {
    %c0_i32 = arith.constant 0 : i32
    %c0_i32_0 = arith.constant 0 : i32
    return %arg0, %c0_i32 : i32, i32
  }
  func.func @transform_3(%arg0: i32) -> (i32, i32) {
    %c0_i32 = arith.constant 0 : i32
    %c0_i32_0 = arith.constant 0 : i32
    return %arg0, %c0_i32 : i32, i32
  }
  func.func @transform_4(%arg0: i32) -> (i32, i32) {
    %c0_i32 = arith.constant 0 : i32
    %c0_i32_0 = arith.constant 0 : i32
    return %arg0, %c0_i32 : i32, i32
  }
}

</mosaic_0001>

<bundles_post_ra>
// kernel: tpu_custom_call.1
= control target key start
LH: loop header
LB: loop body
LE: loop exit
PB: predicated region body
PF: predicated region fallthrough
CT: control target
= control target key end

     0   :  { %s1020_s0 = inlined_call_operand.hbm [shape: f32[16,128], index: 0, kind: input, shape index: {}]   ;;  %s1021_s1 = inlined_call_operand.hbm [shape: f32[16,128], index: 1, kind: input, shape index: {}]   ;;  %s1022_s2 = inlined_call_operand.hbm [shape: f32[16,128], index: 2, kind: input, shape index: {}]   ;;  %s1023_s3 = inlined_call_operand.hbm [shape: f32[16,128], index: 3, kind: output, shape index: {0}]   ;;  %s1024_s4 = inlined_call_operand.hbm [shape: f32[16,128], index: 4, kind: output, shape index: {1}]  }
   0x1   :  { %1029 = sst [smem:[#allocation17_spill]] %s1020_s0 }
   0x2   :  { %1030 = sst [smem:[#allocation18_spill]] %s1021_s1 }
   0x3   :  { %10 = vsyncpa [#allocation3], 0 }
   0x4   :  { %12 = vsyncpa [#allocation3 + $0x1], 0 }
   0x5   :  { %13 = vsyncpa [#allocation6], 0 }
   0x6   :  { %15 = vsyncpa [#allocation6 + $0x1], 0 }
   0x7   :  { %16 = vsyncpa [#allocation4], 0 }
   0x8   :  { %18 = vsyncpa [#allocation4 + $0x1], 0 }
   0x9   :  { %19 = vsyncpa [#allocation10], 0 }
   0xa   :  { %21 = vsyncpa [#allocation10 + $0x1], 0  ;;  %s779_s15 = smov 0   ;;  %s781_s16 = smov 0  }
   0xb   :  { %s783_s17 = smov 0   ;;  %s785_s18 = smov 0  }
   0xc LB: > { %1031 = sst [smem:[#allocation15_spill]] %s743_s17  ;;  %s800_s19 = sadd.s32 4294967295, %s747_s18   ;;  %s747_s18 = sphi %s785_s18, %s1052_s18   ;;  %s743_s17 = sphi %s783_s17, %s1049_s17   ;;  %s739_s16 = sphi %s781_s16, %s1051_s16   ;;  %s735_s15 = sphi %s779_s15, %s1050_s15  }
   0xd   : > { %s483_s20 = sadd.s32 4294967294, %s747_s18   ;;  %s804_s21 = sadd.s32 1, %s747_s18  }
   0xe   : > { %s34_s22 = sadd.s32 1, %s743_s17  ;;  %s31_s23 = ssub.s32 %s747_s18, %s804_s21 }
   0xf   : > { %p41_p0 = scmp.ne.s32.totalorder %s743_s17, %s739_s16  ;;  %p32_p1 = scmp.eq.s32.totalorder %s31_s23, 0 }
  0x10   : > { %p42_p2 = scmp.eq.s32.totalorder %s747_s18, 0  ;;  %p47_p3 = scmp.ne.s32.totalorder %s739_s16, %s735_s15 }
  0x11   : > { %p48_p4 = scmp.eq.s32.totalorder %s800_s19, 0  ;;  %p123_p7 = scmp.eq.s32.totalorder %s800_s19, 1 }
  0x12   : > { %s816_s24 = scalar_select %p32_p1, %s743_s17, %s34_s22  }
  0x13   : > { %p43_p5 = por %p42_p2, %p41_p0  ;;  %p818_p6 = por %p48_p4, %p47_p3 }
  0x14   : > { %1032 = sst [smem:[#allocation16_spill]] %s816_s24  ;;  %p129_p8 = scmp.eq.s32.totalorder %s483_s20, 1 }
  0x15   : > { %s1033_s25 = scalar_select %p818_p6, 1, 0 }
  0x16   : > { %p531_p10 = scmp.lt.s32.totalorder %s747_s18, 2  ;;  %p825_p11 = por %p123_p7, %p41_p0 }
  0x17   : > { %p829_p12 = por %p129_p8, %p47_p3  ;;  %s1025_s28 = sand.u32 1, %s743_s17  }
  0x18   : > { %s1034_s26 = scalar_select %p825_p11, 1, 0 }
  0x19   : > { %s1035_s27 = scalar_select %p829_p12, 1, 0 }
  0x1a   : > { %s835_s29 = sshll.u32 %s747_s18, 7  ;;  %s839_s30 = sshll.u32 %s1025_s28, 3 }
  0x1b   : > { %p841_p13 = pnand %p531_p10, %p43_p5  ;;  %s193_s6 = sand.u32 1, %s747_s18  }
  0x1c   : > { %s1037_s1 = sld [smem:[#allocation18_spill]]  ;;  %s197_s10 = scalar_lea.vmem [#allocation5], %s839_s30 }
  0x1d   : > { %s204_s11 = sshll.u32 %s197_s10, 4  ;;  %s854_s12 = scalar_lea.sflag [#allocation6], %s193_s6  ;;  %s205_s11 = int_to_ptr.vmem [resolvable:$true] %s204_s11 }
  0x1e   : > { %p860_p2 = pneg %p841_p13 }
  0x22   : > { %s850_s9 = scalar_lea.hbm %s1037_s1, %s835_s29  ;;  %s570_s23 = scalar_lea.hbm %s1037_s1, 256 }
  0x23   : > { %s565_s13 = scalar_lea.hbm %s850_s9, 128  ;;  %p571_p5 = scmp.lt.s32.totalorder %s850_s9, %s1037_s1 }
  0x24   : > { %p566_p1 = scmp.ne.s32.totalorder %s850_s9, %s565_s13  ;;  %p572_p7 = scmp.lt.s32.totalorder %s570_s23, %s565_s13 }
  0x26   : > { %p568_p3 = pnand %p860_p2, %p566_p1  ;;  %p573_p8 = por %p572_p7, %p571_p5 }
  0x28   : > { %p569_p4 = pneg %p568_p3 }
  0x2a   : > { %p574_p10 = pnand %p573_p8, %p569_p4 }
  0x2c   : > { %577 = shalt.err (!%p574_p10)
}
  0x2d   : > { %s578_s6 = scalar_lea.vmem %s205_s11, 128  ;;  %s749_s10 = smov [#allocation5]  }
  0x2e   : > { %p579_p9 = scmp.ne.s32.totalorder %s205_s11, %s578_s6  ;;  %s583_s28 = sshll.u32 %s749_s10, 4  ;;  %s584_s28 = int_to_ptr.vmem [resolvable:$false] %s583_s28 }
  0x2f   : > { %s585_s24 = scalar_lea.vmem %s584_s28, 256  ;;  %p586_p1 = scmp.lt.s32.totalorder %s205_s11, %s584_s28 }
  0x30   : > { %p581_p0 = pnand %p579_p9, %p860_p2  ;;  %p587_p3 = scmp.lt.s32.totalorder %s585_s24, %s578_s6 }
  0x32   : > { %p582_p12 = pneg %p581_p0  ;;  %p588_p11 = por %p587_p3, %p586_p1 }
  0x34   : > { %p589_p6 = pnand %p588_p11, %p582_p12 }
  0x36   : > { %592 = shalt.err (!%p589_p6)
}
  0x37   : > { %520 = dma.hbm_to_vmem [thread:$0]  (!%p841_p13), %s850_s9, 128, %s205_s11, %s854_s12  }
  0x38   : > { %p227_p9 = scmp.lt.s32.totalorder %s747_s18, 3  ;;  %s1039_s0 = sld [smem:[#allocation17_spill]] }
  0x39   : > { %p1040_p0 = scmp.ge.s32.totalorder %s747_s18, 1  ;;  %s179_s22 = scalar_lea.vmem [#allocation2], %s839_s30 }
  0x3a   : > { %s186_s23 = sshll.u32 %s179_s22, 4  ;;  %s1042_s7 = sand.u32 1, %s743_s17   ;;  %s187_s23 = int_to_ptr.vmem [resolvable:$true] %s186_s23 }
  0x3b   : > { %p888_p6 = pnand %p1040_p0, %p227_p9  ;;  %s176_s8 = scalar_lea.sflag [#allocation3], %s1042_s7 }
  0x3d   : > { %s1041_s24 = scalar_select %p888_p6, 1, 0 }
  0x3e   : > { %s884_s28 = scalar_lea.hbm %s1039_s0, %s835_s29  ;;  %s598_s10 = scalar_lea.hbm %s1039_s0, 256 }
  0x3f   : > { %s593_s9 = scalar_lea.hbm %s884_s28, 128  ;;  %p599_p5 = scmp.lt.s32.totalorder %s884_s28, %s1039_s0 }
  0x40   : > { %p594_p11 = scmp.ne.s32.totalorder %s884_s28, %s593_s9  ;;  %p600_p7 = scmp.lt.s32.totalorder %s598_s10, %s593_s9 }
  0x42   : > { %p596_p12 = pnand %p594_p11, %p860_p2  ;;  %p601_p8 = por %p600_p7, %p599_p5 }
  0x44   : > { %p597_p4 = pneg %p596_p12 }
  0x46   : > { %p602_p10 = pnand %p601_p8, %p597_p4 }
  0x48   : > { %605 = shalt.err (!%p602_p10)
}
  0x49   : > { %s606_s22 = scalar_lea.vmem %s187_s23, 128  ;;  %s750_s7 = smov [#allocation2]  }
  0x4a   : > { %p607_p1 = scmp.ne.s32.totalorder %s187_s23, %s606_s22  ;;  %s611_s1 = sshll.u32 %s750_s7, 4  ;;  %s612_s1 = int_to_ptr.vmem [resolvable:$false] %s611_s1 }
  0x4b   : > { %s613_s17 = scalar_lea.vmem %s612_s1, 256  ;;  %p614_p0 = scmp.lt.s32.totalorder %s187_s23, %s612_s1 }
  0x4c   : > { %p609_p3 = pnand %p607_p1, %p860_p2  ;;  %p615_p11 = scmp.lt.s32.totalorder %s613_s17, %s606_s22 }
  0x4e   : > { %p610_p9 = pneg %p609_p3  ;;  %p616_p12 = por %p615_p11, %p614_p0 }
  0x50   : > { %p617_p6 = pnand %p616_p12, %p610_p9 }
  0x52   : > { %620 = shalt.err (!%p617_p6)
}
  0x53   : > { %517 = dma.hbm_to_vmem [thread:$0]  (!%p841_p13), %s884_s28, 128, %s187_s23, %s176_s8  }
  0x54   : > { %s220_s6 = scalar_lea.hbm %s1022_s2, %s835_s29  ;;  %s215_s10 = scalar_lea.vmem [#allocation7], %s839_s30 }
  0x55   : > { %s222_s13 = sshll.u32 %s215_s10, 4  ;;  %s621_s20 = scalar_lea.hbm %s220_s6, 128  ;;  %s223_s13 = int_to_ptr.vmem [resolvable:$true] %s222_s13 }
  0x56   : > { %p622_p4 = scmp.ne.s32.totalorder %s220_s6, %s621_s20  ;;  %s626_s22 = scalar_lea.hbm %s1022_s2, 256 }
  0x57   : > { %p627_p6 = scmp.lt.s32.totalorder %s220_s6, %s1022_s2  ;;  %p628_p8 = scmp.lt.s32.totalorder %s626_s22, %s621_s20 }
  0x58   : > { %p624_p5 = pnand %p622_p4, %p860_p2 }
  0x59   : > { %p629_p10 = por %p628_p8, %p627_p6 }
  0x5a   : > { %p625_p7 = pneg %p624_p5 }
  0x5c   : > { %p630_p1 = pnand %p629_p10, %p625_p7 }
  0x5e   : > { %633 = shalt.err (!%p630_p1)
}
  0x5f   : > { %s634_s29 = scalar_lea.vmem %s223_s13, 128  ;;  %s751_s30 = smov [#allocation7]  }
  0x60   : > { %p635_p3 = scmp.ne.s32.totalorder %s223_s13, %s634_s29  ;;  %s639_s28 = sshll.u32 %s751_s30, 4  ;;  %s640_s28 = int_to_ptr.vmem [resolvable:$false] %s639_s28 }
  0x61   : > { %s641_s23 = scalar_lea.vmem %s640_s28, 256  ;;  %p642_p11 = scmp.lt.s32.totalorder %s223_s13, %s640_s28 }
  0x62   : > { %p637_p9 = pnand %p635_p3, %p860_p2  ;;  %p643_p12 = scmp.lt.s32.totalorder %s641_s23, %s634_s29 }
  0x64   : > { %p638_p0 = pneg %p637_p9  ;;  %p644_p4 = por %p643_p12, %p642_p11 }
  0x66   : > { %p645_p5 = pnand %p644_p4, %p638_p0 }
  0x68   : > { %648 = shalt.err (!%p645_p5)
}
  0x69   : > { %523 = dma.hbm_to_vmem [thread:$0]  (!%p841_p13), %s220_s6, 128, %s223_s13, %s854_s12  }
  0x6a   : > { %p1043_p7 = scmp.ne.s32.totalorder %s1041_s24, 0 }
  0x6b   : > { %s932_s0 = sand.u32 (!%p1043_p7), 1, %s739_s16   ;;  %p1044_p2 = scmp.ne.s32.totalorder (!%p1043_p7), %s1033_s25, 0 }
  0x6c   : > { %231 = sbr.rel (%p1043_p7) target bundleno = 166 (0xa6), region = 32  ;;  %s493_s14 = sshll.u32 (!%p1043_p7), %s932_s0, 3 }
  0x6d   : > { %s234_s8 = scalar_lea.sflag (!%p1043_p7), [#allocation3], %s932_s0  ;;  %s237_s9 = scalar_lea.vmem (!%p1043_p7), [#allocation2], %s493_s14 }
  0x71   : > { %718 = dma.done.wait (%p1044_p2), %s234_s8, 128  }
  0x72   : > { %720 = vsyncadd (%p1044_p2), %s234_s8, 4294967168  ;;  %s242_s5 = sand.u32 1, %s800_s19   ;;  %s246_s24 = scalar_lea.vmem [#allocation5], %s493_s14 }
  0x73   : > { %s243_s12 = scalar_lea.sflag [#allocation6], %s242_s5 }
  0x74   : > { %722 = dma.done.wait (%p1044_p2), %s243_s12, 256  }
  0x75   : > { %724 = vsyncadd (%p1044_p2), %s243_s12, 4294967040  ;;  %s287_s11 = scalar_lea.vmem [#allocation8], %s493_s14  ;;  %s294_s10 = scalar_lea.vmem [#allocation9], %s493_s14  ;;  %v296_v1 = vld [vmem:[%s237_s9] sm:$0xff]  ;;  %v298_v2 = vld [vmem:[%s246_s24] sm:$0xff] }
  0x76   : > { %s325_s6 = sshll.u32 %s287_s11, 4  ;;  %s338_s13 = sshll.u32 %s294_s10, 4  ;;  %s946_s6 = int_to_ptr.vmem [resolvable:$true] %s325_s6  ;;  %s948_s13 = int_to_ptr.vmem [resolvable:$true] %s338_s13 }
  0x77   : > { %s255_s20 = scalar_lea.vmem [#allocation7], %s493_s14  ;;  %s500_s1 = sshll.u32 %s800_s19, 7 }
  0x78   : > { %v295_v0 = vld [vmem:[%s255_s20] sm:$0xff]  ;;  %s953_s22 = scalar_lea.hbm %s1023_s3, %s500_s1  ;;  %s958_s19 = scalar_lea.hbm %s1024_s4, %s500_s1 }
  0x79   : > { %v297_v3 = vsub.f32 %v296_v1, %v295_v0  ;;  %v299_v4 = vsub.f32 %v298_v2, %v295_v0  ;;  %s307_s30 = scalar_lea.sflag [#allocation4], %s932_s0  ;;  %s649_s28 = scalar_lea.vmem %s946_s6, 128 }
  0x7a   : > { %p650_p13 = scmp.ne.s32.totalorder %s946_s6, %s649_s28  ;;  %p1045_p6 = scmp.ne.s32.totalorder %s1034_s26, 0 }
  0x7b   : > { %v300_v5 = vmul.f32 %v299_v4, %v297_v3  ;;  %v303_v6 = vmul.f32 %v297_v3, %v297_v3  ;;  %s752_s23 = smov [#allocation8]  }
  0x7c   : > { %p651_p8 = pnand %p650_p13, %p1045_p6  ;;  %s653_s14 = sshll.u32 %s752_s23, 4  ;;  %s654_s14 = int_to_ptr.vmem [resolvable:$false] %s653_s14 }
  0x7d   : > { %302 = vst [vmem:[%s287_s11] sm:$0xff] %v300_v5  ;;  %305 = vst [vmem:[%s294_s10] sm:$0xff] %v303_v6  ;;  %s655_s8 = scalar_lea.vmem %s654_s14, 256  ;;  %p656_p1 = scmp.lt.s32.totalorder %s946_s6, %s654_s14 }
  0x7e   : > { %p652_p10 = pneg %p651_p8  ;;  %p657_p3 = scmp.lt.s32.totalorder %s655_s8, %s649_s28 }
  0x80   : > { %p658_p9 = por %p657_p3, %p656_p1 }
  0x82   : > { %p659_p0 = pnand %p658_p9, %p652_p10 }
  0x84   : > { %662 = shalt.err (!%p659_p0)
}
  0x85   : > { %s663_s9 = scalar_lea.hbm %s953_s22, 128  ;;  %s667_s24 = scalar_lea.hbm %s1023_s3, 256 }
  0x86   : > { %p664_p11 = scmp.ne.s32.totalorder %s953_s22, %s663_s9  ;;  %p668_p5 = scmp.lt.s32.totalorder %s953_s22, %s1023_s3 }
  0x87   : > { %p669_p7 = scmp.lt.s32.totalorder %s667_s24, %s663_s9 }
  0x88   : > { %p665_p12 = pnand %p664_p11, %p1045_p6 }
  0x89   : > { %p670_p2 = por %p669_p7, %p668_p5 }
  0x8a   : > { %p666_p4 = pneg %p665_p12 }
  0x8c   : > { %p671_p13 = pnand %p670_p2, %p666_p4 }
  0x8e   : > { %674 = shalt.err (!%p671_p13)
}
  0x8f   : > { %510 = dma.vmem_to_hbm [thread:$0]  (%p1045_p6), %s946_s6, 128, %s953_s22, %s307_s30  }
  0x90   : > { %s312_s20 = scalar_lea.sflag [#allocation10], %s932_s0  ;;  %s675_s1 = scalar_lea.vmem %s948_s13, 128 }
  0x91   : > { %p676_p8 = scmp.ne.s32.totalorder %s948_s13, %s675_s1  ;;  %s753_s25 = smov [#allocation9]  }
  0x92   : > { %s679_s17 = sshll.u32 %s753_s25, 4  ;;  %s680_s17 = int_to_ptr.vmem [resolvable:$false] %s679_s17 }
  0x93   : > { %p677_p10 = pnand %p676_p8, %p1045_p6  ;;  %s681_s7 = scalar_lea.vmem %s680_s17, 256 }
  0x94   : > { %p682_p3 = scmp.lt.s32.totalorder %s948_s13, %s680_s17  ;;  %p683_p9 = scmp.lt.s32.totalorder %s681_s7, %s675_s1 }
  0x95   : > { %p678_p1 = pneg %p677_p10 }
  0x96   : > { %p684_p0 = por %p683_p9, %p682_p3 }
  0x98   : > { %p685_p11 = pnand %p684_p0, %p678_p1 }
  0x9a   : > { %688 = shalt.err (!%p685_p11)
}
  0x9b   : > { %s689_s6 = scalar_lea.hbm %s958_s19, 128  ;;  %s693_s29 = scalar_lea.hbm %s1024_s4, 256 }
  0x9c   : > { %p690_p12 = scmp.ne.s32.totalorder %s958_s19, %s689_s6  ;;  %p694_p7 = scmp.lt.s32.totalorder %s958_s19, %s1024_s4 }
  0x9d   : > { %p695_p2 = scmp.lt.s32.totalorder %s693_s29, %s689_s6 }
  0x9e   : > { %p691_p4 = pnand %p690_p12, %p1045_p6 }
  0x9f   : > { %p696_p13 = por %p695_p2, %p694_p7 }
  0xa0   : > { %p692_p5 = pneg %p691_p4 }
  0xa2   : > { %p697_p8 = pnand %p696_p13, %p692_p5 }
  0xa4   : > { %700 = shalt.err (!%p697_p8)
}
  0xa5   : > { %511 = dma.vmem_to_hbm [thread:$0]  (%p1045_p6), %s948_s13, 128, %s958_s19, %s312_s20  }
  0xa6 PF: > { %s350_s23 = sand.u32 1, %s735_s15   ;;  %p1046_p10 = scmp.ne.s32.totalorder %s1035_s27, 0 }
  0xa7   : > { %p1047_p1 = scmp.ge.s32.totalorder %s747_s18, 2  ;;  %s351_s14 = scalar_lea.sflag [#allocation4], %s350_s23 }
  0xa9   : > { %p525_p3 = pnand %p1047_p1, %p1046_p10 }
  0xab   : > { %p526_p9 = pneg %p525_p3 }
  0xad   : > { %726 = dma.done.wait (%p526_p9), %s351_s14, 128  }
  0xae   : > { %728 = vsyncadd (%p526_p9), %s351_s14, 4294967168  ;;  %s360_s8 = scalar_lea.sflag [#allocation10], %s350_s23 }
  0xaf   : > { %730 = dma.done.wait (%p526_p9), %s360_s8, 128  }
  0xb0   : > { %732 = vsyncadd (%p526_p9), %s360_s8, 4294967168  ;;  %s1048_s26 = sld [smem:[#allocation15_spill]]  ;;  %p24_p6 = scmp.ge.s32.totalorder %s804_s21, 4  }
  0xb1   : > { %s1049_s17 = sld [smem:[#allocation16_spill]]  ;;  %s1050_s15 = smov %s739_s16 }
  0xb2   : > { %s1052_s18 = smov %s804_s21  ;;  %26 = sbr.rel (!%p24_p6) target bundleno = 12 (0xc), region = 118 }
  0xb6   : > { %s1051_s16 = smov %s1048_s26 }
  0xb7   :  { %365 = vsyncpa [#allocation3], 1 }
  0xb8   :  { %367 = vsyncpa [#allocation3 + $0x1], 1 }
  0xb9   :  { %368 = vsyncpa [#allocation6], 1 }
  0xba   :  { %370 = vsyncpa [#allocation6 + $0x1], 1 }
  0xbb   :  { %371 = vsyncpa [#allocation4], 1 }
  0xbc   :  { %373 = vsyncpa [#allocation4 + $0x1], 1 }
  0xbd   :  { %374 = vsyncpa [#allocation10], 1 }
  0xbe   :  { %376 = vsyncpa [#allocation10 + $0x1], 1 }

</bundles_post_ra>
